<compile_context>
chip_gen: v5e
topology: v5e:2x2
jax: 0.10.0
libtpu: 0.0.40
codegen_flags: <defaults>
</compile_context>

<pallas_src>
import jax
import jax.numpy as jnp
from jax.experimental import pallas as pl
from jax.experimental.pallas import tpu as pltpu

_LANES = 128


def _mish_kernel(x_ref, o_ref):
    x = x_ref[...].astype(jnp.float32)
    # tanh(softplus(x)) == t / (t + 2), with t = e * (e + 2), e = exp(x).
    # Guard x > 20 (torch softplus threshold): result is exactly x there, and
    # the min() keeps exp() from overflowing / producing inf*0 NaNs.
    e = jnp.exp(jnp.minimum(x, 20.0))
    t = e * (e + 2.0)
    y = x * (t / (t + 2.0))
    o_ref[...] = jnp.where(x > 20.0, x, y).astype(o_ref.dtype)


def mish(x, *, block_bytes=2 << 20):
    """Elementwise mish(x) = x * tanh(softplus(x)) via a Pallas TPU kernel."""
    orig_shape = x.shape
    orig_dtype = x.dtype
    n = x.size

    itemsize = jnp.dtype(orig_dtype).itemsize
    sublane = max(8, 32 // itemsize)       # native packing: 8 f32 / 16 bf16 / 32 i8
    unit = sublane * _LANES

    flat = x.reshape(-1)
    if n % unit == 0:
        padded_n = n                       # common path: pure reshape, no copy
    else:
        padded_n = pl.cdiv(n, unit) * unit  # rare ragged tail: minimal pad only
        flat = jnp.pad(flat, (0, padded_n - n))
    rows = padded_n // _LANES              # rows is a multiple of `sublane`
    x2d = flat.reshape(rows, _LANES)

    # ~block_bytes per block, rounded to the sublane packing (f32: 4096 rows = 2 MiB)
    tr_target = max(sublane, (block_bytes // (_LANES * itemsize)) // sublane * sublane)
    tr = min(tr_target, rows)
    if tr == rows and rows >= 2 * sublane:
        # split so the "parallel" grid axis has >=2 blocks (use both v7x TCs)
        tr = ((rows // 2 + sublane - 1) // sublane) * sublane
    tr = max(sublane, (tr // sublane) * sublane)

    grid = (pl.cdiv(rows, tr),)

    out2d = pl.pallas_call(
        _mish_kernel,
        out_shape=jax.ShapeDtypeStruct((rows, _LANES), orig_dtype),
        grid_spec=pltpu.PrefetchScalarGridSpec(
            num_scalar_prefetch=0,
            grid=grid,
            in_specs=[pl.BlockSpec((tr, _LANES), lambda i: (i, 0))],
            out_specs=pl.BlockSpec((tr, _LANES), lambda i: (i, 0)),
        ),
        compiler_params=pltpu.CompilerParams(
            dimension_semantics=("parallel",),
        ),
    )(x2d)

    out_flat = out2d.reshape(padded_n)
    if padded_n != n:
        out_flat = out_flat[:n]
    return out_flat.reshape(orig_shape)


def _mish_ref(x):
    # reference mirroring torch: x * tanh(softplus(x)), softplus threshold=20
    xf = x.astype(jnp.float32)
    sp = jnp.where(xf > 20.0, xf, jnp.log1p(jnp.exp(jnp.minimum(xf, 20.0))))
    return (xf * jnp.tanh(sp)).astype(x.dtype)


if __name__ == "__main__":
    key = jax.random.PRNGKey(0)
    # NCHW input, consistent with the PyTorch module's conv-style usage
    x = jax.random.normal(key, (2, 4, 16, 16), dtype=jnp.float32) * 3.0

    y = jax.block_until_ready(mish(x))
    y_ref = _mish_ref(x)

    assert y.shape == x.shape and y.dtype == x.dtype
    assert jnp.allclose(y, y_ref, atol=1e-5, rtol=1e-5)

    # also exercise the ragged-tail path (n not a multiple of sublane*128)
    x_odd = jax.random.normal(jax.random.PRNGKey(1), (3, 5, 7, 11), dtype=jnp.float32) * 3.0
    y_odd = jax.block_until_ready(mish(x_odd))
    assert jnp.allclose(y_odd, _mish_ref(x_odd), atol=1e-5, rtol=1e-5)

    print("KERNEL_OK")
</pallas_src>

<mosaic_0001>
module attributes {stable_mosaic.version = 11 : i64} {
  func.func @_mish_kernel(%arg0: i32, %arg1: memref<8x128xf32, #tpu.memory_space<vmem>>, %arg2: memref<8x128xf32, #tpu.memory_space<vmem>>) attributes {dimension_semantics = [#tpu.dimension_semantics<parallel>], iteration_bounds = array<i64: 2>, scalar_prefetch = 0 : i64, scratch_operands = 0 : i64, tpu.core_type = #tpu.core_type<tc>, window_params = [{transform_indices = @transform_0, window_bounds = array<i64: 8, 128>}, {transform_indices = @transform_1, window_bounds = array<i64: 8, 128>}]} {
    %c0 = arith.constant 0 : index
    %c0_0 = arith.constant 0 : index
    %0 = vector.load %arg1[%c0, %c0_0] : memref<8x128xf32, #tpu.memory_space<vmem>>, vector<8x128xf32>
    %cst = arith.constant 2.000000e+01 : f32
    %1 = vector.broadcast %cst : f32 to vector<8x128xf32>
    %2 = arith.minimumf %0, %1 : vector<8x128xf32>
    %3 = math.exp %2 : vector<8x128xf32>
    %cst_1 = arith.constant 2.000000e+00 : f32
    %4 = vector.broadcast %cst_1 : f32 to vector<8x128xf32>
    %5 = arith.addf %3, %4 : vector<8x128xf32>
    %6 = arith.mulf %3, %5 : vector<8x128xf32>
    %cst_2 = arith.constant 2.000000e+00 : f32
    %7 = vector.broadcast %cst_2 : f32 to vector<8x128xf32>
    %8 = arith.addf %6, %7 : vector<8x128xf32>
    %9 = arith.divf %6, %8 : vector<8x128xf32>
    %10 = arith.mulf %0, %9 : vector<8x128xf32>
    %cst_3 = arith.constant 2.000000e+01 : f32
    %11 = vector.broadcast %cst_3 : f32 to vector<8x128xf32>
    %12 = arith.cmpf ogt, %0, %11 : vector<8x128xf32>
    %13 = arith.select %12, %0, %10 : vector<8x128xi1>, vector<8x128xf32>
    %c0_4 = arith.constant 0 : index
    %c0_5 = arith.constant 0 : index
    %14 = vector.load %arg2[%c0_4, %c0_5] : memref<8x128xf32, #tpu.memory_space<vmem>>, vector<8x128xf32>
    tpu.vector_store %arg2[%c0_4, %c0_5], %13 {strides = array<i32>} : memref<8x128xf32, #tpu.memory_space<vmem>>, vector<8x128xf32>,
    return
  }
  func.func @transform_0(%arg0: i32) -> (i32, i32) {
    %c0_i32 = arith.constant 0 : i32
    %c0_i32_0 = arith.constant 0 : i32
    return %arg0, %c0_i32 : i32, i32
  }
  func.func @transform_1(%arg0: i32) -> (i32, i32) {
    %c0_i32 = arith.constant 0 : i32
    %c0_i32_0 = arith.constant 0 : i32
    return %arg0, %c0_i32 : i32, i32
  }
}

</mosaic_0001>

<bundles_post_ra>
// kernel: tpu_custom_call.1
= control target key start
LH: loop header
LB: loop body
LE: loop exit
PB: predicated region body
PF: predicated region fallthrough
CT: control target
= control target key end

     0   :  { %6 = vsyncpa [#allocation3], 0  ;;  %s547_s0 = inlined_call_operand.hbm [shape: f32[16,128], index: 0, kind: input, shape index: {}]   ;;  %s548_s1 = inlined_call_operand.hbm [shape: f32[16,128], index: 1, kind: output, shape index: {}]  }
   0x1   :  { %8 = vsyncpa [#allocation3 + $0x1], 0 }
   0x2   :  { %9 = vsyncpa [#allocation4], 0 }
   0x3   :  { %11 = vsyncpa [#allocation4 + $0x1], 0  ;;  %s416_s6 = smov 0   ;;  %s418_s7 = smov 0  }
   0x4   :  { %s420_s8 = smov 0   ;;  %s422_s9 = smov 0  }
   0x5 LB: > { %s437_s10 = sadd.s32 4294967295, %s404_s9   ;;  %s246_s11 = sadd.s32 4294967294, %s404_s9   ;;  %s404_s9 = sphi %s422_s9, %s558_s9   ;;  %s400_s8 = sphi %s420_s8, %s557_s8   ;;  %s396_s7 = sphi %s418_s7, %s556_s7   ;;  %s392_s6 = sphi %s416_s6, %s555_s6  }
   0x6   : > { %s441_s12 = sadd.s32 1, %s404_s9   ;;  %s24_s13 = sadd.s32 1, %s400_s8 }
   0x7   : > { %s21_s14 = ssub.s32 %s404_s9, %s441_s12  ;;  %p31_p0 = scmp.ne.s32.totalorder %s400_s8, %s396_s7 }
   0x8   : > { %p22_p1 = scmp.eq.s32.totalorder %s21_s14, 0  ;;  %p32_p2 = scmp.eq.s32.totalorder %s404_s9, 0 }
   0x9   : > { %p37_p3 = scmp.ne.s32.totalorder %s396_s7, %s392_s6  ;;  %p38_p4 = scmp.eq.s32.totalorder %s437_s10, 0 }
   0xa   : > { %s453_s15 = scalar_select %p22_p1, %s400_s8, %s24_s13  }
   0xb   : > { %p455_p5 = por %p32_p2, %p31_p0  ;;  %p459_p6 = por %p38_p4, %p37_p3 }
   0xc   : > { %p61_p7 = scmp.eq.s32.totalorder %s437_s10, 1  ;;  %p67_p8 = scmp.eq.s32.totalorder %s246_s11, 1 }
   0xd   : > { %p270_p10 = scmp.lt.s32.totalorder %s404_s9, 2  ;;  %s87_s20 = sand.u32 1, %s400_s8  }
   0xe   : > { %p466_p11 = por %p61_p7, %p31_p0  ;;  %p470_p12 = por %p67_p8, %p37_p3 }
   0xf   : > { %s250_s21 = sshll.u32 %s404_s9, 3  ;;  %s249_s22 = sshll.u32 %s87_s20, 3 }
  0x10   : > { %s95_s25 = scalar_lea.hbm %s547_s0, %s250_s21  ;;  %s91_s27 = scalar_lea.vmem [#allocation2], %s249_s22 }
  0x11   : > { %s97_s26 = sshll.u32 %s95_s25, 4  ;;  %s99_s28 = sshll.u32 %s91_s27, 4  ;;  %s98_s26 = int_to_ptr.hbm [resolvable:$true] %s97_s26  ;;  %s100_s28 = int_to_ptr.vmem [resolvable:$true] %s99_s28 }
  0x12   : > { %p481_p13 = pnand %p270_p10, %p455_p5  ;;  %p251_p0 = scmp.ge.s32.totalorder %s404_s9, 1 }
  0x13   : > { %p104_p1 = scmp.lt.s32.totalorder %s404_s9, 3  ;;  %s88_s30 = scalar_lea.sflag [#allocation3], %s87_s20 }
  0x14   : > { %s308_s2 = sshra.s32 %s98_s26, 4  ;;  %p312_p3 = pneg %p481_p13  ;;  %s309_s2 = int_to_ptr.hbm [resolvable:$true] %s308_s2 }
  0x15   : > { %s310_s3 = scalar_lea.hbm %s309_s2, 8  ;;  %s315_s11 = scalar_lea.hbm %s547_s0, 16 }
  0x16   : > { %p311_p2 = scmp.ne.s32.totalorder %s309_s2, %s310_s3  ;;  %p316_p5 = scmp.lt.s32.totalorder %s309_s2, %s547_s0 }
  0x17   : > { %p317_p8 = scmp.lt.s32.totalorder %s315_s11, %s310_s3 }
  0x18   : > { %p313_p4 = pnand %p312_p3, %p311_p2 }
  0x19   : > { %p318_p10 = por %p317_p8, %p316_p5 }
  0x1a   : > { %p314_p7 = pneg %p313_p4 }
  0x1c   : > { %p319_p9 = pnand %p318_p10, %p314_p7 }
  0x1e   : > { %322 = shalt.err (!%p319_p9)
}
  0x1f   : > { %265 = dma.hbm_to_vmem [thread:$0]  (!%p481_p13), %s98_s26, 128, %s100_s28, %s88_s30  }
  0x20   : > { %p105_p2 = pnand %p251_p0, %p104_p1 }
  0x21   : > { %s502_s16 = sand.u32 (!%p105_p2), 1, %s396_s7  }
  0x22   : > { %108 = sbr.rel (%p105_p2) target bundleno = 83 (0x53), region = 24  ;;  %s252_s20 = sshll.u32 (!%p105_p2), %s502_s16, 3 }
  0x23   : > { %s111_s21 = scalar_lea.sflag (!%p105_p2), [#allocation3], %s502_s16  ;;  %s114_s22 = scalar_lea.vmem (!%p105_p2), [#allocation2], %s252_s20 }
  0x27   : > { %383 = dma.done.wait (%p459_p6), %s111_s21, 128  }
  0x28   : > { %385 = vsyncadd (%p459_p6), %s111_s21, 4294967168  ;;  %v134_v0 = vld [vmem:[%s114_s22] sm:$0xff]  ;;  %s255_s17 = sshll.u32 %s437_s10, 3  ;;  %s133_s26 = scalar_lea.vmem [#allocation5], %s252_s20 }
  0x29   : > { %v135_v1 = vmin.f32 %v134_v0, 20.0  ;;  %s171_s25 = scalar_lea.hbm %s548_s1, %s255_s17  ;;  %s173_s27 = sshll.u32 %s133_s26, 4  ;;  %vm157_vm4 = vcmp.gt.f32.partialorder %v134_v0, 20.0  ;;  %s174_s27 = int_to_ptr.vmem [resolvable:$true] %s173_s27 }
  0x2a   : > { %s175_s28 = sshll.u32 %s171_s25, 4  ;;  %s161_s10 = scalar_lea.sflag [#allocation4], %s502_s16  ;;  %s176_s28 = int_to_ptr.hbm [resolvable:$true] %s175_s28 }
  0x2b   : > { %v136_v2 = vmul.f32 1.442695, %v135_v1  ;;  %s352_s29 = sshra.s32 %s176_s28, 4  ;;  %s358_s4 = scalar_lea.hbm %s548_s1, 16  ;;  %s353_s29 = int_to_ptr.hbm [resolvable:$true] %s352_s29 }
  0x2c   : > { %s354_s30 = scalar_lea.hbm %s353_s29, 8  ;;  %p359_p0 = scmp.lt.s32.totalorder %s353_s29, %s548_s1 }
  0x2d   : > { %304 = vpow2.f32 %v136_v2  ;;  %p355_p6 = scmp.ne.s32.totalorder %s353_s29, %s354_s30  ;;  %p360_p1 = scmp.lt.s32.totalorder %s358_s4, %s354_s30 }
  0x2f   : > { %p356_p9 = pnand %p355_p6, %p466_p11  ;;  %p361_p3 = por %p360_p1, %p359_p0 }
  0x31   : > { %p357_p13 = pneg %p356_p9 }
  0x33   : > { %v305_v3 = vpop.eup %304  ;;  %p362_p4 = pnand %p361_p3, %p357_p13 }
  0x34   : > { %v138_v4 = vadd.f32 2.0, %v305_v3 }
  0x36   : > { %v139_v5 = vmul.f32 %v305_v3, %v138_v4 }
  0x38   : > { %v140_v6 = vadd.f32 2.0, %v139_v5 }
  0x3a   : > { %306 = vrcp.f32 %v140_v6  ;;  %v152_v9 = vand.u32 2147483648, %v140_v6  ;;  %vm146_vm0 = vweird.f32 %v140_v6  ;;  %v150_v11 = vand.u32 2147483647, %v140_v6 }
  0x3c   : > { %v153_v13 = vor.u32 1.1754944e-38, %v152_v9  ;;  %vm151_vm3 = vcmp.eq.f32.partialorder %v150_v11, 8.507059e+37 }
  0x40   : > { %v307_v7 = vpop.eup %306 }
  0x41   : > { %v142_v8 = vmul.f32 %v307_v7, %v140_v6  ;;  %vm147_vm1 = vweird.f32 %v307_v7 }
  0x42   : > { %vm148_vm2 = vmor %vm146_vm0, %vm147_vm1 }
  0x43   : > { %v143_v10 = vsub.f32 1.0, %v142_v8 }
  0x45   : > { %v144_v12 = vmul.f32 %v307_v7, %v143_v10 }
  0x47   : > { %v145_v14 = vadd.f32 %v307_v7, %v144_v12 }
  0x49   : > { %v149_v15 = vsel %vm148_vm2, %v307_v7, %v145_v14 }
  0x4a   : > { %v154_v16 = vsel %vm151_vm3, %v153_v13, %v149_v15 }
  0x4b   : > { %v155_v17 = vmul.f32 %v154_v16, %v139_v5 }
  0x4d   : > { %v156_v18 = vmul.f32 %v155_v17, %v134_v0 }
  0x4f   : > { %v158_v19 = vsel %vm157_vm4, %v134_v0, %v156_v18 }
  0x50   : > { %159 = vst [vmem:[%s133_s26] sm:$0xff] %v158_v19 }
  0x51   : > { %365 = shalt.err (!%p362_p4)
}
  0x52   : > { %260 = dma.vmem_to_hbm [thread:$0]  (%p466_p11), %s174_s27, 128, %s176_s28, %s161_s10  }
  0x53 PF: > { %s187_s13 = sand.u32 1, %s392_s6   ;;  %p554_p7 = scmp.ge.s32.totalorder %s404_s9, 2 }
  0x54   : > { %s188_s14 = scalar_lea.sflag [#allocation4], %s187_s13 }
  0x55   : > { %p267_p5 = pnand %p554_p7, %p470_p12 }
  0x57   : > { %p268_p8 = pneg %p267_p5 }
  0x59   : > { %387 = dma.done.wait (%p268_p8), %s188_s14, 128  }
  0x5a   : > { %389 = vsyncadd (%p268_p8), %s188_s14, 4294967168  ;;  %p14_p10 = scmp.ge.s32.totalorder %s441_s12, 4   ;;  %s555_s6 = smov %s396_s7 }
  0x5b   : > { %s556_s7 = smov %s400_s8  ;;  %s557_s8 = smov %s453_s15 }
  0x5c   : > { %s558_s9 = smov %s441_s12  ;;  %16 = sbr.rel (!%p14_p10) target bundleno = 5 (0x5), region = 69 }
  0x61   :  { %194 = vsyncpa [#allocation3], 1 }
  0x62   :  { %196 = vsyncpa [#allocation3 + $0x1], 1 }
  0x63   :  { %197 = vsyncpa [#allocation4], 1 }
  0x64   :  { %199 = vsyncpa [#allocation4 + $0x1], 1 }

</bundles_post_ra>
